<compile_context>
chip_gen: v5e
topology: v5e:2x2
jax: 0.10.0
libtpu: 0.0.40
codegen_flags: <defaults>
</compile_context>

<pallas_src>
import functools

import jax
import jax.numpy as jnp
from jax.experimental import pallas as pl
from jax.experimental.pallas import tpu as pltpu


def _round_up(x, m):
    return ((x + m - 1) // m) * m


def _cdiv(a, b):
    return (a + b - 1) // b


def _select_tb(B, block_b):
    """Batch tile: multiple of 16 (bf16 sublane tile), <=256, small padding,
    and >=2 tiles for nontrivial B so v7x can use both TensorCores."""
    if block_b is not None:
        return max(_round_up(block_b, 16), 16)
    TB_CAP = 256
    min_steps = 2 if B >= 32 else 1
    n_steps = max(_cdiv(B, TB_CAP), min_steps)
    return max(_round_up(_cdiv(B, n_steps), 16), 16)


def _select_tn(Cp):
    """Class tile: full Cp when small; otherwise a 128-multiple divisor <=2048
    so the resident weight block stays well inside v7x VMEM."""
    if Cp <= 2048:
        return Cp
    for tn in (2048, 1024, 512, 256, 128):
        if Cp % tn == 0:
            return tn
    return 128  # unreachable: Cp is a multiple of 128


def _resident_spec(shape, index_map):
    """Constant-index blocks don't need double buffering."""
    if hasattr(pl, "Buffered"):
        try:
            return pl.BlockSpec(shape, index_map, pipeline_mode=pl.Buffered(1))
        except TypeError:
            pass
    return pl.BlockSpec(shape, index_map)


def _cls_linear_kernel(x_ref, w_ref, b_ref, out_ref):
    # x_ref:   [TB, Hp]  bf16 (CLS activations)
    # w_ref:   [Hp, TN]  bf16 (fc weight tile, resident / N-tiled)
    # b_ref:   [1,  TN]  f32  (fc bias tile)
    # out_ref: [TB, TN]  f32
    acc = jnp.dot(x_ref[...], w_ref[...],
                  preferred_element_type=jnp.float32)      # MXU, f32 accumulate
    out_ref[...] = (acc + b_ref[...]).astype(out_ref.dtype)


def prepare_fc_params(fc_weight, fc_bias):
    """One-time parameter prep (call once, outside the per-step forward).

    fc_weight: [H, C] float32 (== torch fc.weight.T), fc_bias: [C] float32.
    Returns (w_p [Hp, Cp] bf16, b_p [1, Cp] f32) with Hp, Cp multiples of 128.
    """
    H, C = fc_weight.shape
    Hp, Cp = _round_up(H, 128), _round_up(C, 128)
    w = fc_weight.astype(jnp.bfloat16)
    if (Hp, Cp) != (H, C):
        w = jnp.pad(w, ((0, Hp - H), (0, Cp - C)))
    b = fc_bias.astype(jnp.float32).reshape(1, C)
    if Cp != C:
        b = jnp.pad(b, ((0, 0), (0, Cp - C)))
    return w, b


@functools.partial(jax.jit,
                   static_argnames=("num_classes", "return_gp_cov", "block_b"))
def deterministic_forward(latent_feature, w_p, b_p, *, num_classes,
                          return_gp_cov=False, block_b=None):
    """Equivalent of Deterministic.forward given the backbone's latent_feature.

    latent_feature: [B, S, H] float32
    w_p, b_p:       outputs of prepare_fc_params (padded bf16 weight / f32 bias)
    num_classes:    original (unpadded) C, static
    """
    B, _, H = latent_feature.shape
    Hp, Cp = w_p.shape
    out_dtype = latent_feature.dtype

    tb = _select_tb(B, block_b)
    Bp = _round_up(B, tb)
    nb = Bp // tb

    tn = _select_tn(Cp)
    nj = Cp // tn

    # Single fused slice + cast; pad only what is actually needed.
    cls = latent_feature[:, 0, :].astype(jnp.bfloat16)
    if Bp != B or Hp != H:
        cls = jnp.pad(cls, ((0, Bp - B), (0, Hp - H)))

    # VMEM budget (per step): weight + bias (single-buffered when constant),
    # double-buffered activation and output tiles.
    w_bufs = 1 if nj == 1 else 2
    vmem_need = (Hp * tn * 2 * w_bufs          # bf16 weight tile(s)
                 + 2 * tb * Hp * 2             # bf16 activation tiles
                 + 2 * tb * tn * 4             # f32 output tiles
                 + w_bufs * tn * 4)            # f32 bias tile(s)
    vmem_limit = min(max(2 * vmem_need + (4 << 20), 32 << 20), 64 << 20)

    cost = pl.CostEstimate(
        flops=2 * Bp * Hp * Cp,
        transcendentals=0,
        bytes_accessed=Bp * Hp * 2 + Hp * Cp * 2 + Cp * 4 + Bp * Cp * 4,
    )

    x_spec = pl.BlockSpec((tb, Hp), lambda i, j: (i, 0))
    out_spec = pl.BlockSpec((tb, tn), lambda i, j: (i, j))
    if nj == 1:
        w_spec = _resident_spec((Hp, tn), lambda i, j: (0, j))
        b_spec = _resident_spec((1, tn), lambda i, j: (0, j))
    else:
        w_spec = pl.BlockSpec((Hp, tn), lambda i, j: (0, j))
        b_spec = pl.BlockSpec((1, tn), lambda i, j: (0, j))

    out_p = pl.pallas_call(
        _cls_linear_kernel,
        out_shape=jax.ShapeDtypeStruct((Bp, Cp), out_dtype),
        grid=(nb, nj),
        in_specs=[x_spec, w_spec, b_spec],
        out_specs=out_spec,
        compiler_params=pltpu.CompilerParams(
            dimension_semantics=("parallel", "parallel"),
            vmem_limit_bytes=vmem_limit,
        ),
        cost_estimate=cost,
    )(cls, w_p, b_p)

    out = out_p[:B, :num_classes]
    if return_gp_cov:
        return out, None
    return out


def init_fc_params(key, hidden_size, num_classes):
    """BertLinear init: weight ~ N(0, 0.02), bias = 0. Stored as [H, C]."""
    w = 0.02 * jax.random.normal(key, (hidden_size, num_classes), dtype=jnp.float32)
    b = jnp.zeros((num_classes,), dtype=jnp.float32)
    return w, b


if __name__ == "__main__":
    # Small shapes consistent with the module's forward:
    #   backbone output latent_feature: [B, S, H], fc: H -> num_classes(=28)
    B, S, H, C = 2, 8, 32, 28

    key = jax.random.PRNGKey(0)
    k_lat, k_w, k_lat2 = jax.random.split(key, 3)

    # TODO(synk): the backbone (e.g. BERT encoder) is an injected dependency;
    # its output is synthesized deterministically here instead.
    latent_feature = jax.random.normal(k_lat, (B, S, H), dtype=jnp.float32)

    fc_w, fc_b = init_fc_params(k_w, H, C)
    w_p, b_p = prepare_fc_params(fc_w, fc_b)          # one-time parameter prep

    out = deterministic_forward(latent_feature, w_p, b_p, num_classes=C)
    out = jax.block_until_ready(out)
    assert out.shape == (B, C)

    # Tight reference: same bf16 inputs, f32 accumulation (matches kernel math).
    cls_f32 = latent_feature[:, 0, :].astype(jnp.bfloat16).astype(jnp.float32)
    w_f32 = fc_w.astype(jnp.bfloat16).astype(jnp.float32)
    ref_bf16 = jnp.dot(cls_f32, w_f32, precision=jax.lax.Precision.HIGHEST) + fc_b
    assert jnp.allclose(out, ref_bf16, atol=1e-4, rtol=1e-4)

    # Loose semantic check against the full-precision fc(latent[:, 0, :]).
    ref_f32 = jnp.dot(latent_feature[:, 0, :], fc_w,
                      precision=jax.lax.Precision.HIGHEST) + fc_b
    assert jnp.allclose(out, ref_f32, atol=1e-2, rtol=1e-2)

    # return_gp_cov path matches the PyTorch module: (cls_output, None).
    out2, cov = deterministic_forward(latent_feature, w_p, b_p,
                                      num_classes=C, return_gp_cov=True)
    out2 = jax.block_until_ready(out2)
    assert cov is None
    assert jnp.allclose(out2, out)

    # Exercise the multi-tile batch path (grid > 1, padded batch rows).
    B2 = 40
    latent2 = jax.random.normal(k_lat2, (B2, S, H), dtype=jnp.float32)
    out3 = jax.block_until_ready(
        deterministic_forward(latent2, w_p, b_p, num_classes=C))
    ref3 = jnp.dot(latent2[:, 0, :].astype(jnp.bfloat16).astype(jnp.float32),
                   w_f32, precision=jax.lax.Precision.HIGHEST) + fc_b
    assert out3.shape == (B2, C)
    assert jnp.allclose(out3, ref3, atol=1e-4, rtol=1e-4)

    print("KERNEL_OK")
</pallas_src>

<mosaic_0001>
module attributes {stable_mosaic.version = 11 : i64} {
  func.func @_cls_linear_kernel(%arg0: i32, %arg1: i32, %arg2: memref<16x128xbf16, #tpu.memory_space<vmem>>, %arg3: memref<128x128xbf16, #tpu.memory_space<vmem>>, %arg4: memref<1x128xf32, #tpu.memory_space<vmem>>, %arg5: memref<16x128xf32, #tpu.memory_space<vmem>>) attributes {dimension_semantics = [#tpu.dimension_semantics<parallel>, #tpu.dimension_semantics<parallel>], iteration_bounds = array<i64: 1, 1>, scalar_prefetch = 0 : i64, scratch_operands = 0 : i64, tpu.core_type = #tpu.core_type<tc>, window_params = [{transform_indices = @transform_0, window_bounds = array<i64: 16, 128>}, {pipeline_mode = #tpu.pipeline_mode<synchronous>, transform_indices = @transform_1, window_bounds = array<i64: 128, 128>}, {pipeline_mode = #tpu.pipeline_mode<synchronous>, transform_indices = @transform_2, window_bounds = array<i64: 1, 128>}, {transform_indices = @transform_3, window_bounds = array<i64: 16, 128>}]} {
    %c0 = arith.constant 0 : index
    %c0_0 = arith.constant 0 : index
    %0 = vector.load %arg2[%c0, %c0_0] : memref<16x128xbf16, #tpu.memory_space<vmem>>, vector<16x128xbf16>
    %c0_1 = arith.constant 0 : index
    %c0_2 = arith.constant 0 : index
    %1 = vector.load %arg3[%c0_1, %c0_2] : memref<128x128xbf16, #tpu.memory_space<vmem>>, vector<128x128xbf16>
    %cst = arith.constant dense<0.000000e+00> : vector<16x128xf32>
    %2 = tpu.matmul %0, %1, %cst {dimension_numbers = #tpu.dot_dimension_numbers<[1], [0], [0], [1], [0, 0, 1, 1], [], []>} : vector<16x128xbf16>, vector<128x128xbf16>, vector<16x128xf32> -> vector<16x128xf32>
    %c0_3 = arith.constant 0 : index
    %c0_4 = arith.constant 0 : index
    %3 = vector.load %arg4[%c0_3, %c0_4] : memref<1x128xf32, #tpu.memory_space<vmem>>, vector<1x128xf32>
    %4 = vector.broadcast %3 : vector<1x128xf32> to vector<16x128xf32>
    %5 = arith.addf %2, %4 : vector<16x128xf32>
    %c0_5 = arith.constant 0 : index
    %c0_6 = arith.constant 0 : index
    %6 = vector.load %arg5[%c0_5, %c0_6] : memref<16x128xf32, #tpu.memory_space<vmem>>, vector<16x128xf32>
    tpu.vector_store %arg5[%c0_5, %c0_6], %5 {strides = array<i32>} : memref<16x128xf32, #tpu.memory_space<vmem>>, vector<16x128xf32>,
    return
  }
  func.func @transform_0(%arg0: i32, %arg1: i32) -> (i32, i32) {
    %c0_i32 = arith.constant 0 : i32
    %c0_i32_0 = arith.constant 0 : i32
    return %arg0, %c0_i32 : i32, i32
  }
  func.func @transform_1(%arg0: i32, %arg1: i32) -> (i32, i32) {
    %c0_i32 = arith.constant 0 : i32
    %c0_i32_0 = arith.constant 0 : i32
    return %c0_i32, %arg1 : i32, i32
  }
  func.func @transform_2(%arg0: i32, %arg1: i32) -> (i32, i32) {
    %c0_i32 = arith.constant 0 : i32
    %c0_i32_0 = arith.constant 0 : i32
    return %c0_i32, %arg1 : i32, i32
  }
  func.func @transform_3(%arg0: i32, %arg1: i32) -> (i32, i32) {
    %c0_i32 = arith.constant 0 : i32
    return %arg0, %arg1 : i32, i32
  }
}

</mosaic_0001>

<bundles_post_ra>
// kernel: deterministic_forward.1
= control target key start
LH: loop header
LB: loop body
LE: loop exit
PB: predicated region body
PF: predicated region fallthrough
CT: control target
= control target key end

     0   :  { %8 = vsyncpa [#allocation3], 0  ;;  %s202_s15 = smov [#allocation2]   ;;  %s203_s17 = smov 64   ;;  %s240_s0 = inlined_call_operand.vmem [shape: bf16[16,128], index: 0, kind: input, shape index: {}]   ;;  %s241_s1 = inlined_call_operand.hbm [shape: bf16[128,128], index: 1, kind: input, shape index: {}]   ;;  %s242_s2 = inlined_call_operand.vmem [shape: f32[1,128], index: 2, kind: input, shape index: {}]   ;;  %s243_s3 = inlined_call_operand.vmem [shape: f32[16,128], index: 3, kind: output, shape index: {}]  }
   0x1   :  { %s15_s14 = sshll.u32 %s241_s1, 4  ;;  %s17_s16 = sshll.u32 %s202_s15, 4  ;;  %s16_s14 = int_to_ptr.hbm [resolvable:$true] %s15_s14  ;;  %s18_s16 = int_to_ptr.vmem [resolvable:$true] %s17_s16 }
   0x2   :  { %s204_s18 = smov 4  }
   0x3   :  { %23 = dma.hbm_to_vmem [thread:$0]  %s16_s14, 1024, %s18_s16, [#allocation3], %s203_s17, %s203_s17, %s204_s18  }
   0x4   :  { %200 = dma.done.wait [#allocation3], 1024  }
   0x5   :  { %201 = vsyncadd [#allocation3], 4294966272  ;;  %v171_v0 = vld [vmem:[#allocation2 + $0x38] sm:$0xff]  ;;  %v170_v1 = vld [vmem:[#allocation2 + $0x30] sm:$0xff] }
   0x6   :  { %106 = vmatpush.bf16.msra.mxu0 %v171_v0  ;;  %v169_v2 = vld [vmem:[#allocation2 + $0x28] sm:$0xff]  ;;  %v168_v3 = vld [vmem:[#allocation2 + $0x20] sm:$0xff]  ;;  %v167_v4 = vld [vmem:[#allocation2 + $0x18] sm:$0xff] }
   0x7   :  { %v166_v5 = vld [vmem:[#allocation2 + $0x10] sm:$0xff]  ;;  %v165_v6 = vld [vmem:[#allocation2 + $0x8] sm:$0xff]  ;;  %v164_v7 = vld [vmem:[#allocation2] sm:$0xff] }
   0x8   :  { %v163_v8 = vld [vmem:[%s240_s0] sm:$0xff] }
   0x9   :  { %v175_v9 = vld [vmem:[%s242_s2] ss:$0 sm:$0xff] }
   0xa   :  { %107 = vmatpush.bf16.msra.mxu0 %v170_v1 }
   0xe   :  { %108 = vmatpush.bf16.msra.mxu0 %v169_v2 }
  0x12   :  { %109 = vmatpush.bf16.msra.mxu0 %v168_v3 }
  0x16   :  { %110 = vmatpush.bf16.msra.mxu0 %v167_v4 }
  0x1a   :  { %111 = vmatpush.bf16.msra.mxu0 %v166_v5 }
  0x1e   :  { %112 = vmatpush.bf16.msra.mxu0 %v165_v6 }
  0x22   :  { %113 = vmatpush.bf16.msra.mxu0 %v164_v7 }
  0x25   :  { %114 = vmatmul.bf16.vlgmr.msra.gmra.mxu0 %v163_v8 }
  0xa2   :  { %v115_v10 = vpop.f32.mrf.mxu0 }
  0xa3   :  { %v116_v11 = vadd.f32 %v175_v9, %v115_v10 }
  0xa5   :  { %120 = vst [vmem:[%s243_s3] sm:$0xff] %v116_v11 }
  0xaa   :  { %v117_v12 = vpop.f32.mrf.mxu0 }
  0xab   :  { %v118_v13 = vadd.f32 %v175_v9, %v117_v12 }
  0xad   :  { %121 = vst [vmem:[%s243_s3 + $0x8] sm:$0xff] %v118_v13 }
  0xae   :  { %126 = vsyncpa [#allocation3], 1 }

</bundles_post_ra>
